<compile_context>
chip_gen: v7x
topology: tpu7x:2x2x1
jax: 0.10.0
libtpu: 0.0.40
codegen_flags: <defaults>
</compile_context>

<pallas_src>
import jax
import jax.numpy as jnp
from jax import lax
from jax.experimental import pallas as pl
from jax.experimental.pallas import tpu as pltpu

EPS = 1e-8
LANE = 128


def _round_up(x, m):
    return ((x + m - 1) // m) * m


# ---------------------------------------------------------------------------
# Kernels
# ---------------------------------------------------------------------------
def _fused_uv_kernel(x_ref, u_ref, v_ref, u_out_ref, v_out_ref):
    """Per-batch fused NMF update, factor order (0, 1):
    u <- MU(x, u, v) then v <- MU(x^T, v, u_new).

    Refs (batch dim squeezed): x (M, N), u (M, Rp), v (N, Rp).
    x is read from HBM exactly once for both updates.
    """
    x = x_ref[...]
    u = u_ref[...].astype(jnp.float32)
    v = v_ref[...].astype(jnp.float32)

    # ---- u update (uses old v) ----
    xv = jnp.dot(x, v, preferred_element_type=jnp.float32)             # (M, Rp)
    vtv = lax.dot_general(v, v, (((0,), (0,)), ((), ())),
                          preferred_element_type=jnp.float32)          # (Rp, Rp)
    den_u = jnp.dot(u, vtv, preferred_element_type=jnp.float32)        # (M, Rp)
    u_new = (u * xv) * pl.reciprocal(den_u + EPS, approx=False)
    u_out_ref[...] = u_new.astype(u_out_ref.dtype)

    # ---- v update (uses freshly updated u; x^T fused into the contraction) ----
    xtu = lax.dot_general(x, u_new, (((0,), (0,)), ((), ())),
                          preferred_element_type=jnp.float32)          # (N, Rp)
    utu = lax.dot_general(u_new, u_new, (((0,), (0,)), ((), ())),
                          preferred_element_type=jnp.float32)          # (Rp, Rp)
    den_v = jnp.dot(v, utu, preferred_element_type=jnp.float32)        # (N, Rp)
    v_new = (v * xtu) * pl.reciprocal(den_v + EPS, approx=False)
    v_out_ref[...] = v_new.astype(v_out_ref.dtype)


def _fused_vu_kernel(x_ref, u_ref, v_ref, u_out_ref, v_out_ref):
    """Per-batch fused NMF update, factor order (1, 0):
    v <- MU(x^T, v, u) then u <- MU(x, u, v_new). Single pass over x."""
    x = x_ref[...]
    u = u_ref[...].astype(jnp.float32)
    v = v_ref[...].astype(jnp.float32)

    # ---- v update (uses old u) ----
    xtu = lax.dot_general(x, u, (((0,), (0,)), ((), ())),
                          preferred_element_type=jnp.float32)          # (N, Rp)
    utu = lax.dot_general(u, u, (((0,), (0,)), ((), ())),
                          preferred_element_type=jnp.float32)          # (Rp, Rp)
    den_v = jnp.dot(v, utu, preferred_element_type=jnp.float32)        # (N, Rp)
    v_new = (v * xtu) * pl.reciprocal(den_v + EPS, approx=False)
    v_out_ref[...] = v_new.astype(v_out_ref.dtype)

    # ---- u update (uses freshly updated v) ----
    xv = jnp.dot(x, v_new, preferred_element_type=jnp.float32)         # (M, Rp)
    vtv = lax.dot_general(v_new, v_new, (((0,), (0,)), ((), ())),
                          preferred_element_type=jnp.float32)          # (Rp, Rp)
    den_u = jnp.dot(u, vtv, preferred_element_type=jnp.float32)        # (M, Rp)
    u_new = (u * xv) * pl.reciprocal(den_u + EPS, approx=False)
    u_out_ref[...] = u_new.astype(u_out_ref.dtype)


def _update_u_kernel(x_ref, u_ref, v_ref, o_ref):
    x = x_ref[...]
    u = u_ref[...].astype(jnp.float32)
    v = v_ref[...].astype(jnp.float32)
    xv = jnp.dot(x, v, preferred_element_type=jnp.float32)
    vtv = lax.dot_general(v, v, (((0,), (0,)), ((), ())),
                          preferred_element_type=jnp.float32)
    den = jnp.dot(u, vtv, preferred_element_type=jnp.float32)
    o_ref[...] = ((u * xv) * pl.reciprocal(den + EPS, approx=False)).astype(o_ref.dtype)


def _update_v_kernel(x_ref, u_ref, v_ref, o_ref):
    # update_v(x, u, v) == update_u(x^T, v, u); the transpose is fused into the
    # contraction (contract over M) so x is never materialized transposed.
    x = x_ref[...]
    u = u_ref[...].astype(jnp.float32)
    v = v_ref[...].astype(jnp.float32)
    xtu = lax.dot_general(x, u, (((0,), (0,)), ((), ())),
                          preferred_element_type=jnp.float32)
    utu = lax.dot_general(u, u, (((0,), (0,)), ((), ())),
                          preferred_element_type=jnp.float32)
    den = jnp.dot(v, utu, preferred_element_type=jnp.float32)
    o_ref[...] = ((v * xtu) * pl.reciprocal(den + EPS, approx=False)).astype(o_ref.dtype)


# ---------------------------------------------------------------------------
# pallas_call wrappers
# ---------------------------------------------------------------------------
def _compiler_params(block_bytes):
    # Double-buffered blocks + headroom; clamp to the v7x physical VMEM of 64 MiB.
    vmem_limit = min(max(4 * block_bytes, 16 << 20), 64 << 20)
    return pltpu.CompilerParams(
        dimension_semantics=("parallel",),   # batch axis -> both TCs on v7x
        vmem_limit_bytes=int(vmem_limit),
    )


def _fused_call(kernel, x, u, v):
    B, M, N = x.shape
    Rp = u.shape[-1]
    itemsize = jnp.dtype(x.dtype).itemsize
    block_bytes = itemsize * (M * N + 2 * M * Rp + 2 * N * Rp)
    flops = 4 * B * Rp * (M * N + M * Rp + N * Rp)
    bytes_accessed = itemsize * (x.size + 2 * u.size + 2 * v.size)
    return pl.pallas_call(
        kernel,
        out_shape=(jax.ShapeDtypeStruct((B, M, Rp), u.dtype),
                   jax.ShapeDtypeStruct((B, N, Rp), v.dtype)),
        grid_spec=pltpu.PrefetchScalarGridSpec(
            num_scalar_prefetch=0,
            grid=(B,),
            in_specs=[
                pl.BlockSpec((pl.Squeezed(), M, N), lambda b: (b, 0, 0)),
                pl.BlockSpec((pl.Squeezed(), M, Rp), lambda b: (b, 0, 0)),
                pl.BlockSpec((pl.Squeezed(), N, Rp), lambda b: (b, 0, 0)),
            ],
            out_specs=[
                pl.BlockSpec((pl.Squeezed(), M, Rp), lambda b: (b, 0, 0)),
                pl.BlockSpec((pl.Squeezed(), N, Rp), lambda b: (b, 0, 0)),
            ],
        ),
        compiler_params=_compiler_params(block_bytes),
        cost_estimate=pl.CostEstimate(flops=flops,
                                      transcendentals=B * Rp * (M + N),
                                      bytes_accessed=bytes_accessed),
        input_output_aliases={1: 0, 2: 1},   # u -> u_new, v -> v_new in place
    )(x, u, v)


def _single_update_call(kernel, x, u, v, out_idx):
    """Fallback path for non-default factor orders. out_idx: 1 -> new u, 2 -> new v."""
    B, M, N = x.shape
    Rp = u.shape[-1]
    out_arr = u if out_idx == 1 else v
    itemsize = jnp.dtype(x.dtype).itemsize
    block_bytes = itemsize * (M * N + M * Rp + N * Rp + out_arr.shape[1] * Rp)
    flops = 2 * B * Rp * (M * N + M * Rp + N * Rp)
    bytes_accessed = itemsize * (x.size + u.size + v.size + out_arr.size)
    return pl.pallas_call(
        kernel,
        out_shape=jax.ShapeDtypeStruct(out_arr.shape, out_arr.dtype),
        grid_spec=pltpu.PrefetchScalarGridSpec(
            num_scalar_prefetch=0,
            grid=(B,),
            in_specs=[
                pl.BlockSpec((pl.Squeezed(), M, N), lambda b: (b, 0, 0)),
                pl.BlockSpec((pl.Squeezed(), M, Rp), lambda b: (b, 0, 0)),
                pl.BlockSpec((pl.Squeezed(), N, Rp), lambda b: (b, 0, 0)),
            ],
            out_specs=pl.BlockSpec((pl.Squeezed(), out_arr.shape[1], Rp),
                                   lambda b: (b, 0, 0)),
        ),
        compiler_params=_compiler_params(block_bytes),
        cost_estimate=pl.CostEstimate(flops=flops,
                                      transcendentals=B * out_arr.shape[1] * Rp,
                                      bytes_accessed=bytes_accessed),
        input_output_aliases={out_idx: 0},
    )(x, u, v)


def solver_forward(x, factor_matrices, factor=(0, 1)):
    """Pallas equivalent of Solver.forward with NMF multiplicative updates."""
    u, v = factor_matrices
    R = u.shape[-1]
    Rp = _round_up(R, LANE)   # lane-dense factor layout inside the kernels
    pad = Rp - R
    if pad:
        # Padded columns are zero and stay exactly zero through the update.
        u = jnp.pad(u, ((0, 0), (0, 0), (0, pad)))
        v = jnp.pad(v, ((0, 0), (0, 0), (0, pad)))

    factor = tuple(factor)
    if factor == (0, 1):
        # Fused: one pass over x, u_new kept on-chip for the v update.
        u, v = _fused_call(_fused_uv_kernel, x, u, v)
    elif factor == (1, 0):
        # Fused mirror: one pass over x, v_new kept on-chip for the u update.
        u, v = _fused_call(_fused_vu_kernel, x, u, v)
    else:
        # Generic order: one pallas_call per update (x streamed once per update).
        for j in factor:
            if j == 0:
                u = _single_update_call(_update_u_kernel, x, u, v, 1)
            else:
                v = _single_update_call(_update_v_kernel, x, u, v, 2)

    if pad:
        u = u[..., :R]
        v = v[..., :R]
    return u, v


solver_forward_jit = jax.jit(solver_forward, static_argnames=("factor",))


# ---------------------------------------------------------------------------
# Plain-JAX reference (same semantics), for a sanity check
# ---------------------------------------------------------------------------
def _reference_solver(x, u, v, factor):
    for j in factor:
        if j == 0:
            xv = jnp.einsum('bmn,bnr->bmr', x, v)
            vtv = jnp.einsum('bnr,bns->brs', v, v)
            u = u * xv / (jnp.einsum('bmr,brs->bms', u, vtv) + EPS)
        else:
            xtu = jnp.einsum('bmn,bmr->bnr', x, u)
            utu = jnp.einsum('bmr,bms->brs', u, u)
            v = v * xtu / (jnp.einsum('bnr,brs->bns', v, utu) + EPS)
    return u, v


if __name__ == "__main__":
    key = jax.random.PRNGKey(0)
    kx, ku, kv = jax.random.split(key, 3)

    B, M, N, R = 2, 32, 16, 8   # small synthetic shapes: batched (M x N) matrices, rank R
    # Non-negative data/factors (NMF-style), deterministic init.
    x = jax.random.uniform(kx, (B, M, N), dtype=jnp.float32)
    u0 = jax.random.uniform(ku, (B, M, R), dtype=jnp.float32) + 0.1
    v0 = jax.random.uniform(kv, (B, N, R), dtype=jnp.float32) + 0.1

    ok = True
    for order in [(0, 1), (1, 0), (0,), (1,)]:
        u_out, v_out = solver_forward_jit(x, (u0, v0), factor=order)
        jax.block_until_ready((u_out, v_out))
        u_ref, v_ref = _reference_solver(x, u0, v0, order)
        ok &= bool(jnp.allclose(u_out, u_ref, rtol=1e-5, atol=1e-5))
        ok &= bool(jnp.allclose(v_out, v_ref, rtol=1e-5, atol=1e-5))

    assert ok
    print("KERNEL_OK")
</pallas_src>

<mosaic_0001>
module attributes {stable_mosaic.version = 11 : i64} {
  func.func @_fused_uv_kernel(%arg0: i32, %arg1: memref<1x32x16xf32, #tpu.memory_space<vmem>>, %arg2: memref<1x32x128xf32, #tpu.memory_space<vmem>>, %arg3: memref<1x16x128xf32, #tpu.memory_space<vmem>>, %arg4: memref<1x32x128xf32, #tpu.memory_space<vmem>>, %arg5: memref<1x16x128xf32, #tpu.memory_space<vmem>>) attributes {dimension_semantics = [#tpu.dimension_semantics<parallel>], iteration_bounds = array<i64: 2>, scalar_prefetch = 0 : i64, scratch_operands = 0 : i64, tpu.core_type = #tpu.core_type<tc>, window_params = [{transform_indices = @transform_0, window_bounds = array<i64: 1, 32, 16>}, {transform_indices = @transform_1, window_bounds = array<i64: 1, 32, 128>}, {transform_indices = @transform_2, window_bounds = array<i64: 1, 16, 128>}, {transform_indices = @transform_3, window_bounds = array<i64: 1, 32, 128>}, {transform_indices = @transform_4, window_bounds = array<i64: 1, 16, 128>}]} {
    %c0 = arith.constant 0 : index
    %c0_0 = arith.constant 0 : index
    %c0_1 = arith.constant 0 : index
    %0 = vector.load %arg1[%c0, %c0_0, %c0_1] : memref<1x32x16xf32, #tpu.memory_space<vmem>>, vector<1x32x16xf32>
    %1 = vector.shape_cast %0 : vector<1x32x16xf32> to vector<32x16xf32>
    %c0_2 = arith.constant 0 : index
    %c0_3 = arith.constant 0 : index
    %c0_4 = arith.constant 0 : index
    %2 = vector.load %arg2[%c0_2, %c0_3, %c0_4] : memref<1x32x128xf32, #tpu.memory_space<vmem>>, vector<1x32x128xf32>
    %3 = vector.shape_cast %2 : vector<1x32x128xf32> to vector<32x128xf32>
    %c0_5 = arith.constant 0 : index
    %c0_6 = arith.constant 0 : index
    %c0_7 = arith.constant 0 : index
    %4 = vector.load %arg3[%c0_5, %c0_6, %c0_7] : memref<1x16x128xf32, #tpu.memory_space<vmem>>, vector<1x16x128xf32>
    %5 = vector.shape_cast %4 : vector<1x16x128xf32> to vector<16x128xf32>
    %cst = arith.constant dense<0.000000e+00> : vector<32x128xf32>
    %6 = tpu.matmul %1, %5, %cst {dimension_numbers = #tpu.dot_dimension_numbers<[1], [0], [0], [1], [0, 0, 1, 1], [], []>} : vector<32x16xf32>, vector<16x128xf32>, vector<32x128xf32> -> vector<32x128xf32>
    %cst_8 = arith.constant dense<0.000000e+00> : vector<128x128xf32>
    %7 = tpu.matmul %5, %5, %cst_8 {dimension_numbers = #tpu.dot_dimension_numbers<[0], [0], [1], [1], [0, 1, 1, 1], [], []>} : vector<16x128xf32>, vector<16x128xf32>, vector<128x128xf32> -> vector<128x128xf32>
    %cst_9 = arith.constant dense<0.000000e+00> : vector<32x128xf32>
    %8 = tpu.matmul %3, %7, %cst_9 {dimension_numbers = #tpu.dot_dimension_numbers<[1], [0], [0], [1], [0, 0, 1, 1], [], []>} : vector<32x128xf32>, vector<128x128xf32>, vector<32x128xf32> -> vector<32x128xf32>
    %9 = arith.mulf %3, %6 : vector<32x128xf32>
    %cst_10 = arith.constant 9.99999993E-9 : f32
    %10 = vector.broadcast %cst_10 : f32 to vector<32x128xf32>
    %11 = arith.addf %8, %10 : vector<32x128xf32>
    %12 = tpu.reciprocal %11 : vector<32x128xf32> -> vector<32x128xf32>
    %13 = arith.mulf %9, %12 : vector<32x128xf32>
    %c0_11 = arith.constant 0 : index
    %c0_12 = arith.constant 0 : index
    %c0_13 = arith.constant 0 : index
    %14 = vector.load %arg4[%c0_11, %c0_12, %c0_13] : memref<1x32x128xf32, #tpu.memory_space<vmem>>, vector<1x32x128xf32>
    %15 = vector.shape_cast %14 : vector<1x32x128xf32> to vector<32x128xf32>
    %16 = vector.shape_cast %13 : vector<32x128xf32> to vector<1x32x128xf32>
    tpu.vector_store %arg4[%c0_11, %c0_12, %c0_13], %16 {strides = array<i32>} : memref<1x32x128xf32, #tpu.memory_space<vmem>>, vector<1x32x128xf32>,
    %cst_14 = arith.constant dense<0.000000e+00> : vector<16x128xf32>
    %17 = tpu.matmul %1, %13, %cst_14 {dimension_numbers = #tpu.dot_dimension_numbers<[0], [0], [1], [1], [0, 1, 1, 1], [], []>} : vector<32x16xf32>, vector<32x128xf32>, vector<16x128xf32> -> vector<16x128xf32>
    %cst_15 = arith.constant dense<0.000000e+00> : vector<128x128xf32>
    %18 = tpu.matmul %13, %13, %cst_15 {dimension_numbers = #tpu.dot_dimension_numbers<[0], [0], [1], [1], [0, 1, 1, 1], [], []>} : vector<32x128xf32>, vector<32x128xf32>, vector<128x128xf32> -> vector<128x128xf32>
    %cst_16 = arith.constant dense<0.000000e+00> : vector<16x128xf32>
    %19 = tpu.matmul %5, %18, %cst_16 {dimension_numbers = #tpu.dot_dimension_numbers<[1], [0], [0], [1], [0, 0, 1, 1], [], []>} : vector<16x128xf32>, vector<128x128xf32>, vector<16x128xf32> -> vector<16x128xf32>
    %20 = arith.mulf %5, %17 : vector<16x128xf32>
    %cst_17 = arith.constant 9.99999993E-9 : f32
    %21 = vector.broadcast %cst_17 : f32 to vector<16x128xf32>
    %22 = arith.addf %19, %21 : vector<16x128xf32>
    %23 = tpu.reciprocal %22 : vector<16x128xf32> -> vector<16x128xf32>
    %24 = arith.mulf %20, %23 : vector<16x128xf32>
    %c0_18 = arith.constant 0 : index
    %c0_19 = arith.constant 0 : index
    %c0_20 = arith.constant 0 : index
    %25 = vector.load %arg5[%c0_18, %c0_19, %c0_20] : memref<1x16x128xf32, #tpu.memory_space<vmem>>, vector<1x16x128xf32>
    %26 = vector.shape_cast %25 : vector<1x16x128xf32> to vector<16x128xf32>
    %27 = vector.shape_cast %24 : vector<16x128xf32> to vector<1x16x128xf32>
    tpu.vector_store %arg5[%c0_18, %c0_19, %c0_20], %27 {strides = array<i32>} : memref<1x16x128xf32, #tpu.memory_space<vmem>>, vector<1x16x128xf32>,
    return
  }
  func.func @transform_0(%arg0: i32) -> (i32, i32, i32) {
    %c0_i32 = arith.constant 0 : i32
    %c0_i32_0 = arith.constant 0 : i32
    %c0_i32_1 = arith.constant 0 : i32
    return %arg0, %c0_i32, %c0_i32_0 : i32, i32, i32
  }
  func.func @transform_1(%arg0: i32) -> (i32, i32, i32) {
    %c0_i32 = arith.constant 0 : i32
    %c0_i32_0 = arith.constant 0 : i32
    %c0_i32_1 = arith.constant 0 : i32
    return %arg0, %c0_i32, %c0_i32_0 : i32, i32, i32
  }
  func.func @transform_2(%arg0: i32) -> (i32, i32, i32) {
    %c0_i32 = arith.constant 0 : i32
    %c0_i32_0 = arith.constant 0 : i32
    %c0_i32_1 = arith.constant 0 : i32
    return %arg0, %c0_i32, %c0_i32_0 : i32, i32, i32
  }
  func.func @transform_3(%arg0: i32) -> (i32, i32, i32) {
    %c0_i32 = arith.constant 0 : i32
    %c0_i32_0 = arith.constant 0 : i32
    %c0_i32_1 = arith.constant 0 : i32
    return %arg0, %c0_i32, %c0_i32_0 : i32, i32, i32
  }
  func.func @transform_4(%arg0: i32) -> (i32, i32, i32) {
    %c0_i32 = arith.constant 0 : i32
    %c0_i32_0 = arith.constant 0 : i32
    %c0_i32_1 = arith.constant 0 : i32
    return %arg0, %c0_i32, %c0_i32_0 : i32, i32, i32
  }
}

</mosaic_0001>

<bundles_post_ra>
// kernel: solver_forward.1
= control target key start
LH: loop header
LB: loop body
LE: loop exit
PB: predicated region body
PF: predicated region fallthrough
CT: control target
= control target key end

     0   :  { %s1663_s15 = smov 0   ;;  %s1762_s0 = inlined_call_operand.vmem [shape: f32[2,32,16], index: 0, kind: input, shape index: {}]   ;;  %s1763_s1 = inlined_call_operand.vmem [shape: f32[2,32,128], index: 1, kind: input, shape index: {}, may-alias: {1,3}]   ;;  %s1764_s2 = inlined_call_operand.vmem [shape: f32[2,16,128], index: 2, kind: input, shape index: {}, may-alias: {2,4}]   ;;  %s1765_s3 = inlined_call_operand.vmem [shape: f32[2,32,128], index: 3, kind: output, shape index: {0}, may-alias: {1,3}]   ;;  %s1766_s4 = inlined_call_operand.vmem [shape: f32[2,16,128], index: 4, kind: output, shape index: {1}, may-alias: {2,4}]  }
   0x1 LB: > { %s1219_s16 = sadd.s32 4294967295, %s1636_s15   ;;  %p1223_p0 = scmp.ge.s32.totalorder %s1636_s15, 1  ;;  %s1636_s15 = sphi %s1663_s15, %s15_s15  }
   0x2   : > { %p185_p1 = scmp.lt.s32.totalorder %s1636_s15, 3 }
   0x4   : > { %p186_p2 = pnand %p1223_p0, %p185_p1 }
   0x5   : > { %p226_p3 = scmp.lt.s32.totalorder (!%p186_p2), %s1219_s16, 1  ;;  %vm261_vm0 = vcmask (!%p186_p2), 130048   ;;  %vm717_vm1 = vcmask (!%p186_p2), 261120  }
   0x6   : > { %189 = sbr.rel (%p186_p2) target bundleno = 1290 (0x50a), region = 32 }
   0xd   : > { %s1768_s16 = smov (!%p226_p3, %s1219_s16), 1 }
   0xe   : > { %s1276_s17 = sshll.u32 %s1768_s16, 4  ;;  %s1704_s21 = sshll.u32 %s1768_s16, 5 }
   0xf   : > { %s240_s20 = scalar_lea.vmem %s1764_s2, %s1276_s17  ;;  %s230_s24 = scalar_lea.vmem %s1762_s0, %s1704_s21 }
  0x10   : > { %v1679_v0 = vld [vmem:[%s240_s20] sm:$0xff]  ;;  %v1681_v1 = vld [vmem:[%s240_s20 + $0x8] sm:$0xff]  ;;  %v253_v21 = vld [vmem:[%s230_s24 + $0x10] sm:$0xff]  ;;  %s1716_s27 = scalar_lea.vmem %s1763_s1, %s1704_s21  ;;  %s245_s30 = scalar_lea.vmem %s1765_s3, %s1704_s21 }
  0x11   : > { %359 = vxpose.xlu0.b32.start [1/2] (short) %v1679_v0, 128  ;;  %v1521_v2 = vpack.c.bf16 %v1681_v1, %v1679_v0  ;;  %v251_v19 = vld [vmem:[%s230_s24] sm:$0xff]  ;;  %v252_v20 = vld [vmem:[%s230_s24 + $0x8] sm:$0xff]  ;;  %v254_v22 = vld [vmem:[%s230_s24 + $0x18] sm:$0xff]  ;;  %s250_s7 = scalar_lea.vmem %s1766_s4, %s1276_s17 }
  0x12   : > { %1371 = vmatprep.mubr.msk.f32.mxu0 %vm261_vm0, %v251_v19  ;;  %v1721_v23 = vld [vmem:[%s1716_s27] sm:$0xff]  ;;  %v256_v48 = vld [vmem:[%s1716_s27 + $0x8] sm:$0xff]  ;;  %v257_v49 = vld [vmem:[%s1716_s27 + $0x10] sm:$0xff] }
  0x13   : > { %1526 = vmatprep.subr.bf16.mxu1 %v1521_v2  ;;  %1522 = vmatprep.subr.bf16.mxu0 %v1521_v2  ;;  %v258_v50 = vld [vmem:[%s1716_s27 + $0x18] sm:$0xff] }
  0x14   : > { %1528 = vmatpush3.bf16.msra.mxu1 %v1521_v2  ;;  %1524 = vmatpush3.bf16.msra.mxu0 %v1521_v2 }
  0x15   : > { %360 = vxpose.xlu0.b32.end [2/2] (short) %v1681_v1, 128 }
  0x17   : > { %1372 = vmatmul.mubr.msk.f32.vlgmr.msra.gmra.mrb[0].mxu0 %vm261_vm0, %v252_v20 }
  0x18   : > { %1374 = vmatprep.mubr.msk.f32.mxu0 %vm261_vm0, %v253_v21 }
  0x1b   : > { %1375 = vmatmul.mubr.msk.f32.gmra.mrb[2].mxu0 %vm261_vm0, %v254_v22 }
  0x1c   : > { %1437 = vmatprep.mubr.f32.mxu0 %v1721_v23 }
  0x4e   : > { %685 = vxpose.xlu0.b32.start [1/4] (short) (narrow) %v251_v19, 16 }
  0x52   : > { %686 = vxpose.xlu0.b32.cont [2/4] (short) (narrow) %v252_v20, 16 }
  0x56   : > { %687 = vxpose.xlu0.b32.cont [3/4] (short) (narrow) %v253_v21, 16 }
  0x5a   : > { %688 = vxpose.xlu0.b32.end [4/4] (short) (narrow) %v254_v22, 16 }
  0x91   : > { %v375_v3 = vpop.trf.xlu0 }
  0x92   : > { %1381 = vmatprep.mubr.msk.f32.mxu1 %vm261_vm0, %v375_v3 }
  0x95   : > { %v376_v4 = vpop.trf.xlu0 }
  0x96   : > { %1382 = vmatmul.mubr.msk.f32.vlgmr.msra.gmra.mrb[0].mxu1 %vm261_vm0, %v376_v4 }
  0x99   : > { %v377_v5 = vpop.trf.xlu0 }
  0x9a   : > { %1384 = vmatprep.mubr.msk.f32.mxu1 %vm261_vm0, %v377_v5 }
  0x9d   : > { %v378_v6 = vpop.trf.xlu0 }
  0x9e   : > { %1385 = vmatmul.mubr.msk.f32.gmra.mrb[2].mxu1 %vm261_vm0, %v378_v6 }
  0xa1   : > { %v379_v7 = vpop.trf.xlu0 }
  0xa2   : > { %1387 = vmatprep.mubr.msk.f32.mxu1 %vm261_vm0, %v379_v7 }
  0xa5   : > { %v380_v8 = vpop.trf.xlu0 }
  0xa6   : > { %1388 = vmatmul.mubr.msk.f32.gmra.mrb[4].mxu1 %vm261_vm0, %v380_v8 }
  0xa9   : > { %v381_v9 = vpop.trf.xlu0 }
  0xaa   : > { %1390 = vmatprep.mubr.msk.f32.mxu1 %vm261_vm0, %v381_v9 }
  0xad   : > { %v382_v10 = vpop.trf.xlu0 }
  0xae   : > { %1391 = vmatmul.mubr.msk.f32.gmra.mrb[6].mxu1 %vm261_vm0, %v382_v10 }
  0xb1   : > { %v383_v11 = vpop.trf.xlu0 }
  0xb2   : > { %1393 = vmatprep.mubr.msk.f32.mxu1 %vm261_vm0, %v383_v11 }
  0xb5   : > { %v384_v12 = vpop.trf.xlu0 }
  0xb6   : > { %1394 = vmatmul.mubr.msk.f32.gmra.mrb[8].mxu1 %vm261_vm0, %v384_v12 }
  0xb9   : > { %v385_v13 = vpop.trf.xlu0 }
  0xba   : > { %1396 = vmatprep.mubr.msk.f32.mxu1 %vm261_vm0, %v385_v13 }
  0xbd   : > { %v386_v14 = vpop.trf.xlu0 }
  0xbe   : > { %1397 = vmatmul.mubr.msk.f32.gmra.mrb[10].mxu1 %vm261_vm0, %v386_v14 }
  0xc1   : > { %v387_v15 = vpop.trf.xlu0 }
  0xc2   : > { %1399 = vmatprep.mubr.msk.f32.mxu1 %vm261_vm0, %v387_v15 }
  0xc5   : > { %v388_v16 = vpop.trf.xlu0 }
  0xc6   : > { %1400 = vmatmul.mubr.msk.f32.gmra.mrb[12].mxu1 %vm261_vm0, %v388_v16 }
  0xc9   : > { %v389_v17 = vpop.trf.xlu0 }
  0xca   : > { %1402 = vmatprep.mubr.msk.f32.mxu1 %vm261_vm0, %v389_v17 }
  0xcd   : > { %v390_v18 = vpop.trf.xlu0 }
  0xce   : > { %1403 = vmatmul.mubr.msk.f32.gmra.mrb[14].mxu1 %vm261_vm0, %v390_v18 }
  0xd1   : > { %v701_v15 = vpop.trf.xlu0 }
  0xd2   : > { %1451 = vmatprep.mubr.msk.f32.mxu1 %vm717_vm1, %v701_v15 }
  0xea   : > { %v1373_v51 = vpop.f32.mrb[0].mxu0 }
  0xeb   : > { %v340_v52 = vpop.f32.mrb[1].mxu0  ;;  %v585_v63 = vmul.f32 %v1373_v51, %v256_v48 }
  0xec   : > { %v584_v3 = vmul.f32 %v340_v52, %v1721_v23 }
  0xee   : > { %v1376_v53 = vpop.f32.mrb[2].mxu0 }
  0xef   : > { %v350_v54 = vpop.f32.mrb[3].mxu0  ;;  %v587_v7 = vmul.f32 %v1376_v53, %v258_v50 }
  0xf0   : > { %v586_v9 = vmul.f32 %v350_v54, %v257_v49 }
 0x169   : > { %v1383_v24 = vpop.f32.mrb[0].mxu1 }
 0x16a   : > { %v505_v25 = vpop.f32.mrb[1].mxu1 }
 0x16b   : > { %v1529_v26 = vpack.c.bf16 %v1383_v24, %v505_v25 }
 0x16d   : > { %1530 = vmatprep.subr.bf16.mxu0 %v1529_v26 }
 0x16e   : > { %1532 = vmatpush3.bf16.msra.mxu0 %v1529_v26 }
 0x171   : > { %v1386_v27 = vpop.f32.mrb[2].mxu1 }
 0x172   : > { %v515_v28 = vpop.f32.mrb[3].mxu1 }
 0x173   : > { %v1533_v29 = vpack.c.bf16 %v1386_v27, %v515_v28 }
 0x175   : > { %1534 = vmatprep.subr.bf16.mxu0 %v1533_v29 }
 0x176   : > { %1536 = vmatpush3.bf16.msra.mxu0 %v1533_v29 }
 0x179   : > { %v1389_v30 = vpop.f32.mrb[4].mxu1 }
 0x17a   : > { %v525_v31 = vpop.f32.mrb[5].mxu1 }
 0x17b   : > { %v1537_v32 = vpack.c.bf16 %v1389_v30, %v525_v31 }
 0x17d   : > { %1538 = vmatprep.subr.bf16.mxu0 %v1537_v32 }
 0x17e   : > { %1540 = vmatpush3.bf16.msra.mxu0 %v1537_v32  ;;  %v702_v32 = vpop.trf.xlu0 }
 0x181   : > { %v1392_v33 = vpop.f32.mrb[6].mxu1 }
 0x182   : > { %v535_v34 = vpop.f32.mrb[7].mxu1 }
 0x183   : > { %v1541_v35 = vpack.c.bf16 %v1392_v33, %v535_v34 }
 0x185   : > { %1542 = vmatprep.subr.bf16.mxu0 %v1541_v35 }
 0x186   : > { %1544 = vmatpush3.bf16.msra.mxu0 %v1541_v35 }
 0x189   : > { %v1395_v36 = vpop.f32.mrb[8].mxu1 }
 0x18a   : > { %v545_v37 = vpop.f32.mrb[9].mxu1 }
 0x18b   : > { %v1545_v38 = vpack.c.bf16 %v1395_v36, %v545_v37 }
 0x18d   : > { %1546 = vmatprep.subr.bf16.mxu0 %v1545_v38 }
 0x18e   : > { %1548 = vmatpush3.bf16.msra.mxu0 %v1545_v38 }
 0x191   : > { %v1398_v39 = vpop.f32.mrb[10].mxu1 }
 0x192   : > { %v555_v40 = vpop.f32.mrb[11].mxu1 }
 0x193   : > { %v1549_v41 = vpack.c.bf16 %v1398_v39, %v555_v40 }
 0x195   : > { %1550 = vmatprep.subr.bf16.mxu0 %v1549_v41 }
 0x196   : > { %1552 = vmatpush3.bf16.msra.mxu0 %v1549_v41 }
 0x199   : > { %v1401_v42 = vpop.f32.mrb[12].mxu1 }
 0x19a   : > { %v565_v43 = vpop.f32.mrb[13].mxu1 }
 0x19b   : > { %v1553_v44 = vpack.c.bf16 %v1401_v42, %v565_v43 }
 0x19d   : > { %1554 = vmatprep.subr.bf16.mxu0 %v1553_v44 }
 0x19e   : > { %1556 = vmatpush3.bf16.msra.mxu0 %v1553_v44 }
 0x1a1   : > { %v1404_v45 = vpop.f32.mrb[14].mxu1 }
 0x1a2   : > { %v575_v46 = vpop.f32.mrb[15].mxu1 }
 0x1a3   : > { %v1557_v47 = vpack.c.bf16 %v1404_v45, %v575_v46 }
 0x1a5   : > { %1558 = vmatprep.subr.bf16.mxu0 %v1557_v47 }
 0x1a6   : > { %1560 = vmatpush3.bf16.msra.mxu0 %v1557_v47 }
 0x1a9   : > { %1438 = vmatmul.mubr.f32.vlgmr.msra.gmra.mrb[4].mxu0 %v256_v48 }
 0x1aa   : > { %1440 = vmatprep.mubr.f32.mxu0 %v257_v49 }
 0x1ad   : > { %1441 = vmatmul.mubr.f32.gmra.mrb[6].mxu0 %v258_v50 }
 0x27c   : > { %v1439_v55 = vpop.f32.mrb[4].mxu0 }
 0x27d   : > { %v660_v56 = vadd.f32 1e-08, %v1439_v55  ;;  %v654_v57 = vpop.f32.mrb[5].mxu0 }
 0x27e   : > { %v655_v58 = vadd.f32 1e-08, %v654_v57 }
 0x27f   : > { %1618 = vrcp.f32 %v660_v56 }
 0x280   : > { %1620 = vrcp.f32 %v655_v58  ;;  %v1442_v59 = vpop.f32.mrb[6].mxu0 }
 0x281   : > { %v670_v60 = vadd.f32 1e-08, %v1442_v59  ;;  %v664_v61 = vpop.f32.mrb[7].mxu0 }
 0x282   : > { %v665_v62 = vadd.f32 1e-08, %v664_v61 }
 0x283   : > { %1622 = vrcp.f32 %v670_v60 }
 0x284   : > { %1624 = vrcp.f32 %v665_v62 }
 0x289   : > { %v1619_v2 = vpop.eup %1618 }
 0x28a   : > { %v1621_v4 = vpop.eup %1620  ;;  %v678_v5 = vmul.f32 %v1619_v2, %v585_v63 }
 0x28b   : > { %v677_v6 = vmul.f32 %v1621_v4, %v584_v3 }
 0x28c   : > { %682 = vst [vmem:[%s245_s30 + $0x8] sm:$0xff] %v678_v5 }
 0x28d   : > { %v1623_v8 = vpop.eup %1622  ;;  %799 = vxpose.xlu1.b32.start [1/4] (short) %v677_v6, 128  ;;  %681 = vst [vmem:[%s245_s30] sm:$0xff] %v677_v6  ;;  %v1561_v10 = vpack.c.bf16 %v678_v5, %v677_v6 }
 0x28e   : > { %v1625_v11 = vpop.eup %1624  ;;  %v680_v12 = vmul.f32 %v1623_v8, %v587_v7 }
 0x28f   : > { %1562 = vmatprep.subr.bf16.mxu1 %v1561_v10  ;;  %1570 = vmatprep.subr.bf16.mxu0 %v1561_v10  ;;  %v679_v13 = vmul.f32 %v1625_v11, %v586_v9 }
 0x290   : > { %1564 = vmatpush3.bf16.msra.mxu1 %v1561_v10  ;;  %1572 = vmatpush3.bf16.msra.mxu0 %v1561_v10  ;;  %684 = vst [vmem:[%s245_s30 + $0x18] sm:$0xff] %v680_v12 }
 0x291   : > { %800 = vxpose.xlu1.b32.cont [2/4] (short) %v678_v5, 128  ;;  %683 = vst [vmem:[%s245_s30 + $0x10] sm:$0xff] %v679_v13  ;;  %v1565_v14 = vpack.c.bf16 %v680_v12, %v679_v13 }
 0x293   : > { %1566 = vmatprep.subr.bf16.mxu1 %v1565_v14  ;;  %1574 = vmatprep.subr.bf16.mxu0 %v1565_v14 }
 0x294   : > { %1568 = vmatpush3.bf16.msra.mxu1 %v1565_v14  ;;  %1576 = vmatpush3.bf16.msra.mxu0 %v1565_v14 }
 0x295   : > { %801 = vxpose.xlu1.b32.cont [3/4] (short) %v679_v13, 128 }
 0x297   : > { %1452 = vmatmul.mubr.msk.f32.vlgmr.msra.gmra.mrb[16].mxu1 %vm717_vm1, %v702_v32 }
 0x298   : > { %1518 = vmatprep.mubr.f32.mxu1 %v1679_v0 }
 0x299   : > { %802 = vxpose.xlu1.b32.end [4/4] (short) %v680_v12, 128 }
 0x30d   : > { %v815_v16 = vpop.trf.xlu1 }
 0x30e   : > { %1462 = vmatprep.mubr.msk.f32.mxu0 %vm717_vm1, %v815_v16 }
 0x311   : > { %v816_v17 = vpop.trf.xlu1 }
 0x312   : > { %1463 = vmatmul.mubr.msk.f32.vlgmr.msra.gmra.mrb[8].mxu0 %vm717_vm1, %v816_v17 }
 0x315   : > { %v817_v18 = vpop.trf.xlu1 }
 0x316   : > { %1465 = vmatprep.mubr.msk.f32.mxu0 %vm717_vm1, %v817_v18 }
 0x319   : > { %v818_v19 = vpop.trf.xlu1 }
 0x31a   : > { %1466 = vmatmul.mubr.msk.f32.gmra.mrb[10].mxu0 %vm717_vm1, %v818_v19 }
 0x31d   : > { %v819_v20 = vpop.trf.xlu1 }
 0x31e   : > { %1468 = vmatprep.mubr.msk.f32.mxu0 %vm717_vm1, %v819_v20 }
 0x321   : > { %v820_v21 = vpop.trf.xlu1 }
 0x322   : > { %1469 = vmatmul.mubr.msk.f32.gmra.mrb[12].mxu0 %vm717_vm1, %v820_v21 }
 0x325   : > { %v821_v22 = vpop.trf.xlu1 }
 0x326   : > { %1471 = vmatprep.mubr.msk.f32.mxu0 %vm717_vm1, %v821_v22 }
 0x329   : > { %v822_v23 = vpop.trf.xlu1 }
 0x32a   : > { %1472 = vmatmul.mubr.msk.f32.gmra.mrb[14].mxu0 %vm717_vm1, %v822_v23 }
 0x32d   : > { %v823_v24 = vpop.trf.xlu1 }
 0x32e   : > { %1474 = vmatprep.mubr.msk.f32.mxu0 %vm717_vm1, %v823_v24 }
 0x331   : > { %v824_v25 = vpop.trf.xlu1 }
 0x332   : > { %1475 = vmatmul.mubr.msk.f32.gmra.mrb[16].mxu0 %vm717_vm1, %v824_v25 }
 0x335   : > { %v825_v26 = vpop.trf.xlu1 }
 0x336   : > { %1477 = vmatprep.mubr.msk.f32.mxu0 %vm717_vm1, %v825_v26 }
 0x339   : > { %v826_v27 = vpop.trf.xlu1 }
 0x33a   : > { %1478 = vmatmul.mubr.msk.f32.gmra.mrb[18].mxu0 %vm717_vm1, %v826_v27 }
 0x33d   : > { %v827_v28 = vpop.trf.xlu1 }
 0x33e   : > { %1480 = vmatprep.mubr.msk.f32.mxu0 %vm717_vm1, %v827_v28 }
 0x341   : > { %v828_v29 = vpop.trf.xlu1 }
 0x342   : > { %1481 = vmatmul.mubr.msk.f32.gmra.mrb[20].mxu0 %vm717_vm1, %v828_v29 }
 0x345   : > { %v829_v30 = vpop.trf.xlu1 }
 0x346   : > { %1483 = vmatprep.mubr.msk.f32.mxu0 %vm717_vm1, %v829_v30 }
 0x349   : > { %v830_v31 = vpop.trf.xlu1 }
 0x34a   : > { %1484 = vmatmul.mubr.msk.f32.gmra.mrb[22].mxu0 %vm717_vm1, %v830_v31 }
 0x36a   : > { %v1453_v57 = vpop.f32.mrb[16].mxu1 }
 0x36b   : > { %v790_v58 = vpop.f32.mrb[17].mxu1  ;;  %v1025_v63 = vmul.f32 %v1453_v57, %v1681_v1 }
 0x36c   : > { %v1024_v3 = vmul.f32 %v790_v58, %v1679_v0 }
 0x3e5   : > { %v1464_v33 = vpop.f32.mrb[8].mxu0 }
 0x3e6   : > { %v945_v34 = vpop.f32.mrb[9].mxu0 }
 0x3e7   : > { %v1577_v35 = vpack.c.bf16 %v1464_v33, %v945_v34 }
 0x3e9   : > { %1578 = vmatprep.subr.bf16.mxu1 %v1577_v35 }
 0x3ea   : > { %1580 = vmatpush3.bf16.msra.mxu1 %v1577_v35 }
 0x3ed   : > { %v1467_v36 = vpop.f32.mrb[10].mxu0 }
 0x3ee   : > { %v955_v37 = vpop.f32.mrb[11].mxu0 }
 0x3ef   : > { %v1581_v38 = vpack.c.bf16 %v1467_v36, %v955_v37 }
 0x3f1   : > { %1582 = vmatprep.subr.bf16.mxu1 %v1581_v38 }
 0x3f2   : > { %1584 = vmatpush3.bf16.msra.mxu1 %v1581_v38 }
 0x3f5   : > { %v1470_v39 = vpop.f32.mrb[12].mxu0 }
 0x3f6   : > { %v965_v40 = vpop.f32.mrb[13].mxu0 }
 0x3f7   : > { %v1585_v41 = vpack.c.bf16 %v1470_v39, %v965_v40 }
 0x3f9   : > { %1586 = vmatprep.subr.bf16.mxu1 %v1585_v41 }
 0x3fa   : > { %1588 = vmatpush3.bf16.msra.mxu1 %v1585_v41 }
 0x3fd   : > { %v1473_v42 = vpop.f32.mrb[14].mxu0 }
 0x3fe   : > { %v975_v43 = vpop.f32.mrb[15].mxu0 }
 0x3ff   : > { %v1589_v44 = vpack.c.bf16 %v1473_v42, %v975_v43 }
 0x401   : > { %1590 = vmatprep.subr.bf16.mxu1 %v1589_v44 }
 0x402   : > { %1592 = vmatpush3.bf16.msra.mxu1 %v1589_v44 }
 0x405   : > { %v1476_v45 = vpop.f32.mrb[16].mxu0 }
 0x406   : > { %v985_v46 = vpop.f32.mrb[17].mxu0 }
 0x407   : > { %v1593_v47 = vpack.c.bf16 %v1476_v45, %v985_v46 }
 0x409   : > { %1594 = vmatprep.subr.bf16.mxu1 %v1593_v47 }
 0x40a   : > { %1596 = vmatpush3.bf16.msra.mxu1 %v1593_v47 }
 0x40d   : > { %v1479_v48 = vpop.f32.mrb[18].mxu0 }
 0x40e   : > { %v995_v49 = vpop.f32.mrb[19].mxu0 }
 0x40f   : > { %v1597_v50 = vpack.c.bf16 %v1479_v48, %v995_v49 }
 0x411   : > { %1598 = vmatprep.subr.bf16.mxu1 %v1597_v50 }
 0x412   : > { %1600 = vmatpush3.bf16.msra.mxu1 %v1597_v50 }
 0x415   : > { %v1482_v51 = vpop.f32.mrb[20].mxu0 }
 0x416   : > { %v1005_v52 = vpop.f32.mrb[21].mxu0 }
 0x417   : > { %v1601_v53 = vpack.c.bf16 %v1482_v51, %v1005_v52 }
 0x419   : > { %1602 = vmatprep.subr.bf16.mxu1 %v1601_v53 }
 0x41a   : > { %1604 = vmatpush3.bf16.msra.mxu1 %v1601_v53 }
 0x41d   : > { %v1485_v54 = vpop.f32.mrb[22].mxu0 }
 0x41e   : > { %v1015_v55 = vpop.f32.mrb[23].mxu0 }
 0x41f   : > { %v1605_v56 = vpack.c.bf16 %v1485_v54, %v1015_v55 }
 0x421   : > { %1606 = vmatprep.subr.bf16.mxu1 %v1605_v56 }
 0x422   : > { %1608 = vmatpush3.bf16.msra.mxu1 %v1605_v56 }
 0x425   : > { %1519 = vmatmul.mubr.f32.vlgmr.msra.gmra.mrb[18].mxu1 %v1681_v1 }
 0x4f8   : > { %v1520_v59 = vpop.f32.mrb[18].mxu1 }
 0x4f9   : > { %v1098_v60 = vadd.f32 1e-08, %v1520_v59  ;;  %v1092_v61 = vpop.f32.mrb[19].mxu1 }
 0x4fa   : > { %v1093_v62 = vadd.f32 1e-08, %v1092_v61 }
 0x4fb   : > { %1626 = vrcp.f32 %v1098_v60 }
 0x4fc   : > { %1628 = vrcp.f32 %v1093_v62 }
 0x505   : > { %v1627_v2 = vpop.eup %1626 }
 0x506   : > { %v1629_v4 = vpop.eup %1628  ;;  %v1104_v5 = vmul.f32 %v1627_v2, %v1025_v63 }
 0x507   : > { %v1103_v6 = vmul.f32 %v1629_v4, %v1024_v3 }
 0x508   : > { %1106 = vst [vmem:[%s250_s7 + $0x8] sm:$0xff] %v1104_v5 }
 0x509   : > { %1105 = vst [vmem:[%s250_s7] sm:$0xff] %v1103_v6 }
 0x50a PF: > { %s15_s15 = sadd.s32 1, %s1636_s15  }
 0x50b   : > { %p12_p4 = scmp.ge.s32.totalorder %s15_s15, 4  }
 0x50d   :  { %14 = sbr.rel (!%p12_p4) target bundleno = 1 (0x1), region = 80 }

</bundles_post_ra>
